<compile_context>
chip_gen: v7x
topology: tpu7x:2x2x1
jax: 0.10.0
libtpu: 0.0.40
codegen_flags: <defaults>
</compile_context>

<pallas_src>
import jax
import jax.numpy as jnp
from jax.experimental import pallas as pl
from jax.experimental.pallas import tpu as pltpu

H1 = 256
H2 = 128
OUT = 2
OUT_PAD = 8  # small lane padding of the final layer (full last dim of the output)


def _round_up(x, m):
    return ((x + m - 1) // m) * m


def _cdiv(a, b):
    return (a + b - 1) // b


def mlp_kernel(x_ref, w1_ref, b1_ref, w2_ref, b2_ref, w3_ref, b3_ref, o_ref):
    # x tile: (TB, E) f32, cast to bf16 in-kernel; weights bf16; biases f32.
    x = x_ref[...].astype(jnp.bfloat16)

    # Layer 1: Linear(E, 256) + ReLU  (bf16 operands, f32 accumulate)
    h1 = jnp.dot(x, w1_ref[...], preferred_element_type=jnp.float32) + b1_ref[...]
    h1 = jnp.maximum(h1, 0.0).astype(jnp.bfloat16)

    # Layer 2: Linear(256, 128) + ReLU
    h2 = jnp.dot(h1, w2_ref[...], preferred_element_type=jnp.float32) + b2_ref[...]
    h2 = jnp.maximum(h2, 0.0).astype(jnp.bfloat16)

    # Layer 3: Linear(128, 8-padded)  (columns 2..7 of w3/b3 are zero)
    out = jnp.dot(h2, w3_ref[...], preferred_element_type=jnp.float32) + b3_ref[...]
    o_ref[...] = out.astype(o_ref.dtype)


def mlp_forward(x, w1, b1, w2, b2, w3p, b3p, *, block_b=2048):
    """x: (B, E) float.  Weights bf16 [in, out]; w3p/b3p padded to OUT_PAD lanes."""
    B, E = x.shape
    x = x.astype(jnp.float32)

    # Tile size: multiple of 16 rows; for large B keep >= ~4 grid steps so the
    # v7x megacore ("parallel") has work on both TensorCores; cap at block_b to
    # bound the VMEM footprint on v5e / v7x.
    TB = max(16, _round_up(_cdiv(B, 4), 16))
    TB = min(TB, block_b)
    grid = (_cdiv(B, TB),)

    out_padded = pl.pallas_call(
        mlp_kernel,
        out_shape=jax.ShapeDtypeStruct((B, OUT_PAD), jnp.float32),
        grid=grid,
        in_specs=[
            pl.BlockSpec((TB, E), lambda i: (i, 0)),        # x tile (pipelined)
            pl.BlockSpec((E, H1), lambda i: (0, 0)),        # w1 (resident)
            pl.BlockSpec((1, H1), lambda i: (0, 0)),        # b1
            pl.BlockSpec((H1, H2), lambda i: (0, 0)),       # w2
            pl.BlockSpec((1, H2), lambda i: (0, 0)),        # b2
            pl.BlockSpec((H2, OUT_PAD), lambda i: (0, 0)),  # w3 (padded to 8 lanes)
            pl.BlockSpec((1, OUT_PAD), lambda i: (0, 0)),   # b3 (padded to 8 lanes)
        ],
        out_specs=pl.BlockSpec((TB, OUT_PAD), lambda i: (i, 0)),
        compiler_params=pltpu.CompilerParams(
            dimension_semantics=("parallel",),
        ),
    )(x, w1, b1, w2, b2, w3p, b3p)

    # Strip the lane padding of the final layer.
    return out_padded[:, :OUT]


def init_params(key, embedding_dim):
    # Deterministic init mimicking nn.Linear default (uniform +-1/sqrt(fan_in)).
    ks = jax.random.split(key, 6)

    def linear(kw, kb, fan_in, fan_out):
        bound = 1.0 / jnp.sqrt(fan_in)
        # stored as [in, out] so the kernel computes x @ W (same semantics as
        # PyTorch's x @ W.T with W stored [out, in]).
        w = jax.random.uniform(kw, (fan_in, fan_out), jnp.float32, -bound, bound)
        b = jax.random.uniform(kb, (1, fan_out), jnp.float32, -bound, bound)
        return w, b

    w1, b1 = linear(ks[0], ks[1], embedding_dim, H1)
    w2, b2 = linear(ks[2], ks[3], H1, H2)
    w3, b3 = linear(ks[4], ks[5], H2, OUT)
    return w1, b1, w2, b2, w3, b3


def prepare_params(w1, b1, w2, b2, w3, b3):
    """Cast weights to bf16 and zero-pad the last layer to OUT_PAD output lanes."""
    w3p = jnp.zeros((H2, OUT_PAD), jnp.float32).at[:, :OUT].set(w3)
    b3p = jnp.zeros((1, OUT_PAD), jnp.float32).at[:, :OUT].set(b3)
    return (
        w1.astype(jnp.bfloat16), b1.astype(jnp.float32),
        w2.astype(jnp.bfloat16), b2.astype(jnp.float32),
        w3p.astype(jnp.bfloat16), b3p.astype(jnp.float32),
    )


def ref_forward(x, w1, b1, w2, b2, w3, b3):
    # Reference with the same bf16-operand / f32-accumulate numerics as the kernel.
    bf = jnp.bfloat16
    h1 = jnp.dot(x.astype(bf), w1.astype(bf), preferred_element_type=jnp.float32) + b1
    h1 = jnp.maximum(h1, 0.0)
    h2 = jnp.dot(h1.astype(bf), w2.astype(bf), preferred_element_type=jnp.float32) + b2
    h2 = jnp.maximum(h2, 0.0)
    return jnp.dot(h2.astype(bf), w3.astype(bf), preferred_element_type=jnp.float32) + b3


if __name__ == "__main__":
    key = jax.random.PRNGKey(0)
    embedding_dim = 32
    batch = 8

    k_x, k_p = jax.random.split(key)
    x = jax.random.normal(k_x, (batch, embedding_dim), jnp.float32)
    w1, b1, w2, b2, w3, b3 = init_params(k_p, embedding_dim)
    kernel_params = prepare_params(w1, b1, w2, b2, w3, b3)

    out = mlp_forward(x, *kernel_params)
    out = jax.block_until_ready(out)

    ref = ref_forward(x, w1, b1, w2, b2, w3, b3)

    assert out.shape == (batch, OUT)
    assert jnp.allclose(out, ref, atol=1e-3, rtol=1e-3), (
        f"max abs err = {jnp.max(jnp.abs(out - ref))}"
    )

    print("KERNEL_OK")
</pallas_src>

<mosaic_0001>
module attributes {stable_mosaic.version = 11 : i64} {
  func.func @mlp_kernel(%arg0: i32, %arg1: memref<16x32xf32, #tpu.memory_space<vmem>>, %arg2: memref<32x256xbf16, #tpu.memory_space<vmem>>, %arg3: memref<1x256xf32, #tpu.memory_space<vmem>>, %arg4: memref<256x128xbf16, #tpu.memory_space<vmem>>, %arg5: memref<1x128xf32, #tpu.memory_space<vmem>>, %arg6: memref<128x8xbf16, #tpu.memory_space<vmem>>, %arg7: memref<1x8xf32, #tpu.memory_space<vmem>>, %arg8: memref<16x8xf32, #tpu.memory_space<vmem>>) attributes {dimension_semantics = [#tpu.dimension_semantics<parallel>], iteration_bounds = array<i64: 1>, scalar_prefetch = 0 : i64, scratch_operands = 0 : i64, tpu.core_type = #tpu.core_type<tc>, window_params = [{transform_indices = @transform_0, window_bounds = array<i64: 16, 32>}, {pipeline_mode = #tpu.pipeline_mode<synchronous>, transform_indices = @transform_1, window_bounds = array<i64: 32, 256>}, {pipeline_mode = #tpu.pipeline_mode<synchronous>, transform_indices = @transform_2, window_bounds = array<i64: 1, 256>}, {pipeline_mode = #tpu.pipeline_mode<synchronous>, transform_indices = @transform_3, window_bounds = array<i64: 256, 128>}, {pipeline_mode = #tpu.pipeline_mode<synchronous>, transform_indices = @transform_4, window_bounds = array<i64: 1, 128>}, {pipeline_mode = #tpu.pipeline_mode<synchronous>, transform_indices = @transform_5, window_bounds = array<i64: 128, 8>}, {pipeline_mode = #tpu.pipeline_mode<synchronous>, transform_indices = @transform_6, window_bounds = array<i64: 1, 8>}, {transform_indices = @transform_7, window_bounds = array<i64: 16, 8>}]} {
    %c0 = arith.constant 0 : index
    %c0_0 = arith.constant 0 : index
    %0 = vector.load %arg1[%c0, %c0_0] : memref<16x32xf32, #tpu.memory_space<vmem>>, vector<16x32xf32>
    %1 = arith.truncf %0 : vector<16x32xf32> to vector<16x32xbf16>
    %c0_1 = arith.constant 0 : index
    %c0_2 = arith.constant 0 : index
    %2 = vector.load %arg2[%c0_1, %c0_2] : memref<32x256xbf16, #tpu.memory_space<vmem>>, vector<32x256xbf16>
    %cst = arith.constant dense<0.000000e+00> : vector<16x256xf32>
    %3 = tpu.matmul %1, %2, %cst {dimension_numbers = #tpu.dot_dimension_numbers<[1], [0], [0], [1], [0, 0, 1, 1], [], []>} : vector<16x32xbf16>, vector<32x256xbf16>, vector<16x256xf32> -> vector<16x256xf32>
    %c0_3 = arith.constant 0 : index
    %c0_4 = arith.constant 0 : index
    %4 = vector.load %arg3[%c0_3, %c0_4] : memref<1x256xf32, #tpu.memory_space<vmem>>, vector<1x256xf32>
    %5 = vector.broadcast %4 : vector<1x256xf32> to vector<16x256xf32>
    %6 = arith.addf %3, %5 : vector<16x256xf32>
    %cst_5 = arith.constant 0.000000e+00 : f32
    %7 = vector.broadcast %cst_5 : f32 to vector<16x256xf32>
    %8 = arith.maximumf %6, %7 : vector<16x256xf32>
    %9 = arith.truncf %8 : vector<16x256xf32> to vector<16x256xbf16>
    %c0_6 = arith.constant 0 : index
    %c0_7 = arith.constant 0 : index
    %10 = vector.load %arg4[%c0_6, %c0_7] : memref<256x128xbf16, #tpu.memory_space<vmem>>, vector<256x128xbf16>
    %cst_8 = arith.constant dense<0.000000e+00> : vector<16x128xf32>
    %11 = tpu.matmul %9, %10, %cst_8 {dimension_numbers = #tpu.dot_dimension_numbers<[1], [0], [0], [1], [0, 0, 1, 1], [], []>} : vector<16x256xbf16>, vector<256x128xbf16>, vector<16x128xf32> -> vector<16x128xf32>
    %c0_9 = arith.constant 0 : index
    %c0_10 = arith.constant 0 : index
    %12 = vector.load %arg5[%c0_9, %c0_10] : memref<1x128xf32, #tpu.memory_space<vmem>>, vector<1x128xf32>
    %13 = vector.broadcast %12 : vector<1x128xf32> to vector<16x128xf32>
    %14 = arith.addf %11, %13 : vector<16x128xf32>
    %cst_11 = arith.constant 0.000000e+00 : f32
    %15 = vector.broadcast %cst_11 : f32 to vector<16x128xf32>
    %16 = arith.maximumf %14, %15 : vector<16x128xf32>
    %17 = arith.truncf %16 : vector<16x128xf32> to vector<16x128xbf16>
    %c0_12 = arith.constant 0 : index
    %c0_13 = arith.constant 0 : index
    %18 = vector.load %arg6[%c0_12, %c0_13] : memref<128x8xbf16, #tpu.memory_space<vmem>>, vector<128x8xbf16>
    %cst_14 = arith.constant dense<0.000000e+00> : vector<16x8xf32>
    %19 = tpu.matmul %17, %18, %cst_14 {dimension_numbers = #tpu.dot_dimension_numbers<[1], [0], [0], [1], [0, 0, 1, 1], [], []>} : vector<16x128xbf16>, vector<128x8xbf16>, vector<16x8xf32> -> vector<16x8xf32>
    %c0_15 = arith.constant 0 : index
    %c0_16 = arith.constant 0 : index
    %20 = vector.load %arg7[%c0_15, %c0_16] : memref<1x8xf32, #tpu.memory_space<vmem>>, vector<1x8xf32>
    %21 = vector.broadcast %20 : vector<1x8xf32> to vector<16x8xf32>
    %22 = arith.addf %19, %21 : vector<16x8xf32>
    %c0_17 = arith.constant 0 : index
    %c0_18 = arith.constant 0 : index
    %23 = vector.load %arg8[%c0_17, %c0_18] : memref<16x8xf32, #tpu.memory_space<vmem>>, vector<16x8xf32>
    tpu.vector_store %arg8[%c0_17, %c0_18], %22 {strides = array<i32>} : memref<16x8xf32, #tpu.memory_space<vmem>>, vector<16x8xf32>,
    return
  }
  func.func @transform_0(%arg0: i32) -> (i32, i32) {
    %c0_i32 = arith.constant 0 : i32
    %c0_i32_0 = arith.constant 0 : i32
    return %arg0, %c0_i32 : i32, i32
  }
  func.func @transform_1(%arg0: i32) -> (i32, i32) {
    %c0_i32 = arith.constant 0 : i32
    %c0_i32_0 = arith.constant 0 : i32
    %c0_i32_1 = arith.constant 0 : i32
    return %c0_i32, %c0_i32_0 : i32, i32
  }
  func.func @transform_2(%arg0: i32) -> (i32, i32) {
    %c0_i32 = arith.constant 0 : i32
    %c0_i32_0 = arith.constant 0 : i32
    %c0_i32_1 = arith.constant 0 : i32
    return %c0_i32, %c0_i32_0 : i32, i32
  }
  func.func @transform_3(%arg0: i32) -> (i32, i32) {
    %c0_i32 = arith.constant 0 : i32
    %c0_i32_0 = arith.constant 0 : i32
    %c0_i32_1 = arith.constant 0 : i32
    return %c0_i32, %c0_i32_0 : i32, i32
  }
  func.func @transform_4(%arg0: i32) -> (i32, i32) {
    %c0_i32 = arith.constant 0 : i32
    %c0_i32_0 = arith.constant 0 : i32
    %c0_i32_1 = arith.constant 0 : i32
    return %c0_i32, %c0_i32_0 : i32, i32
  }
  func.func @transform_5(%arg0: i32) -> (i32, i32) {
    %c0_i32 = arith.constant 0 : i32
    %c0_i32_0 = arith.constant 0 : i32
    %c0_i32_1 = arith.constant 0 : i32
    return %c0_i32, %c0_i32_0 : i32, i32
  }
  func.func @transform_6(%arg0: i32) -> (i32, i32) {
    %c0_i32 = arith.constant 0 : i32
    %c0_i32_0 = arith.constant 0 : i32
    %c0_i32_1 = arith.constant 0 : i32
    return %c0_i32, %c0_i32_0 : i32, i32
  }
  func.func @transform_7(%arg0: i32) -> (i32, i32) {
    %c0_i32 = arith.constant 0 : i32
    %c0_i32_0 = arith.constant 0 : i32
    return %arg0, %c0_i32 : i32, i32
  }
}

</mosaic_0001>

<bundles_post_ra>
// kernel: tpu_custom_call.1
= control target key start
LH: loop header
LB: loop body
LE: loop exit
PB: predicated region body
PF: predicated region fallthrough
CT: control target
= control target key end

     0   :  { %12 = vsyncpa [#allocation3], 0  ;;  %s738_s0 = inlined_call_operand.vmem [shape: f32[8,32], index: 0, kind: input, shape index: {}]   ;;  %s739_s1 = inlined_call_operand.vmem [shape: bf16[32,256], index: 1, kind: input, shape index: {}]   ;;  %s740_s2 = inlined_call_operand.vmem [shape: f32[1,256], index: 2, kind: input, shape index: {}]   ;;  %s741_s3 = inlined_call_operand.hbm [shape: bf16[256,128], index: 3, kind: input, shape index: {}]   ;;  %s742_s4 = inlined_call_operand.vmem [shape: f32[1,128], index: 4, kind: input, shape index: {}]   ;;  %s743_s5 = inlined_call_operand.vmem [shape: bf16[128,8], index: 5, kind: input, shape index: {}]   ;;  %s744_s6 = inlined_call_operand.vmem [shape: f32[1,8], index: 6, kind: input, shape index: {}]   ;;  %s745_s7 = inlined_call_operand.hbm [shape: f32[8,8], index: 7, kind: output, shape index: {}]  }
   0x1   :  { %13 = vsyncpa [#allocation4], 0  ;;  %s614_s24 = smov [#allocation2]   ;;  %s566_s28 = scalar_lea.hbm %s741_s3, 2048 }
   0x2   :  { %s25_s25 = sshll.u32 %s614_s24, 4  ;;  %p567_p0 = scmp.ne.s32.totalorder %s741_s3, %s566_s28  ;;  %s26_s25 = int_to_ptr.vmem [resolvable:$true] %s25_s25 }
   0x3   :  { %p570_p1 = scmp.lt.u32.totalorder %s566_s28, %s741_s3 }
   0x5   :  { %p572_p2 = pnand %p570_p1, %p567_p0 }
   0x7   :  { %575 = shalt.err (!%p572_p2)
}
   0x8   :  { %s576_s10 = scalar_lea.vmem %s26_s25, 2048  ;;  %p581_p4 = scmp.lt.s32.totalorder %s26_s25, %s26_s25 }
   0x9   :  { %p577_p3 = scmp.ne.s32.totalorder %s26_s25, %s576_s10  ;;  %p582_p5 = scmp.lt.s32.totalorder %s576_s10, %s576_s10 }
   0xb   :  { %p583_p6 = por %p582_p5, %p581_p4 }
   0xd   :  { %p584_p7 = pnand %p583_p6, %p577_p3 }
   0xf   :  { %587 = shalt.err (!%p584_p7)
}
  0x10   :  { %s615_s11 = smov 64   ;;  %s616_s12 = smov 4  }
  0x11   :  { %31 = dma.hbm_to_vmem [thread:$0]  %s741_s3, 2048, %s26_s25, [#allocation3], %s615_s11, %s615_s11, %s616_s12  }
  0x12   :  { %610 = dma.done.wait [#allocation3], 2048  }
  0x13   :  { %611 = vsyncadd [#allocation3], 4294965248  ;;  %v617_v0 = vmov 0   ;;  %v536_v1 = vld [vmem:[%s739_s1 + $0x4] ss:$8 sps:$4 sm:$0xff]   ;;  %vm81_vm0 = vcmask 261120   ;;  %v51_v30 = vlaneseq }
  0x14   :  { %117 = vmatprep.mubr.bf16.mxu0 %v617_v0  ;;  %v538_v2 = vld [vmem:[%s739_s1] ss:$8 sps:$4 sm:$0xff]   ;;  %85 = vmatprep.subr.bf16.mxu0 %v536_v1  ;;  %v539_v3 = vld [vmem:[%s739_s1 + $0x14] ss:$8 sps:$4 sm:$0xff]   ;;  %v541_v4 = vld [vmem:[%s739_s1 + $0x10] ss:$8 sps:$4 sm:$0xff]  }
  0x15   :  { %v42_v5 = vld [vmem:[%s738_s0] sm:$0xff]  ;;  %86 = vmatpush1.bf16.msra.mxu0 %v538_v2  ;;  %v43_v6 = vld [vmem:[%s738_s0 + $0x8] sm:$0xff]  ;;  %v546_v12 = vld [vmem:[#allocation2 + $0x50] sm:$0xff]   ;;  %v618_v25 = vmov 0.0   ;;  %v52_v31 = vshrl.u32 %v51_v30, 7  ;;  %vm619_vm1 = vmmov 0  }
  0x16   :  { %87 = vmatprep.subr.bf16.mxu0 %v539_v3  ;;  %v542_v7 = vld [vmem:[#allocation2 + $0x40] sm:$0xff]   ;;  %v44_v9 = vpack.c.bf16 %v43_v6, %v42_v5  ;;  %v544_v10 = vld [vmem:[#allocation2 + $0x48] sm:$0xff]   ;;  %v547_v13 = vld [vmem:[#allocation2 + $0x10] sm:$0xff]   ;;  %vm425_vm2 = vcmask 64512  }
  0x17   :  { %v543_v8 = vld [vmem:[#allocation2] sm:$0xff]   ;;  %476 = vmatprep.subr.bf16.mxu1 %v542_v7  ;;  %v545_v11 = vld [vmem:[#allocation2 + $0x8] sm:$0xff]   ;;  %v548_v14 = vld [vmem:[#allocation2 + $0x58] sm:$0xff]   ;;  %v53_v32 = vsub.s32 0, %v52_v31  ;;  %v57_v34 = vsub.s32 1, %v52_v31 }
  0x18   :  { %477 = vmatpush3.bf16.msra.mxu1 %v543_v8  ;;  %v549_v15 = vld [vmem:[#allocation2 + $0x18] sm:$0xff]   ;;  %v550_v16 = vld [vmem:[#allocation2 + $0x60] sm:$0xff]   ;;  %v552_v18 = vld [vmem:[#allocation2 + $0x68] sm:$0xff]  }
  0x19   :  { %88 = vmatpush1.bf16.msra.mxu0 %v541_v4  ;;  %478 = vmatprep.subr.bf16.mxu1 %v544_v10  ;;  %v551_v17 = vld [vmem:[#allocation2 + $0x20] sm:$0xff]   ;;  %v553_v19 = vld [vmem:[#allocation2 + $0x28] sm:$0xff]   ;;  %v554_v20 = vld [vmem:[#allocation2 + $0x70] sm:$0xff]  }
  0x1a   :  { %v555_v21 = vld [vmem:[#allocation2 + $0x30] sm:$0xff]   ;;  %v556_v22 = vld [vmem:[#allocation2 + $0x78] sm:$0xff]   ;;  %v558_v24 = vld [vmem:[%s743_s5] sm:$0xff]   ;;  %507 = vmatprep.subr.bf16.mxu0 %v618_v25 }
  0x1b   :  { %v557_v23 = vld [vmem:[#allocation2 + $0x38] sm:$0xff]   ;;  %v559_v26 = vld [vmem:[%s743_s5 + $0x8] sm:$0xff]   ;;  %v560_v27 = vld [vmem:[%s743_s5 + $0x10] sm:$0xff]  }
  0x1c   :  { %449 = vmatmul.mubr.msk.bf16.vlgmr.msra.gmra.mrb[0].mxu0 %vm81_vm0, %v44_v9  ;;  %479 = vmatpush3.bf16.msra.mxu1 %v545_v11  ;;  %v561_v28 = vld [vmem:[%s743_s5 + $0x18] sm:$0xff]   ;;  %v562_v29 = vld [vmem:[%s743_s5 + $0x20] sm:$0xff]   ;;  %v563_v51 = vld [vmem:[%s743_s5 + $0x28] sm:$0xff]  }
  0x1d   :  { %480 = vmatprep.subr.bf16.mxu1 %v546_v12  ;;  %508 = vmatpush3.bf16.msra.mxu0 %v558_v24  ;;  %v49_v33 = vld [vmem:[%s740_s2] sm:$0x3]  ;;  %v564_v52 = vld [vmem:[%s743_s5 + $0x30] sm:$0xff]   ;;  %v565_v53 = vld [vmem:[%s743_s5 + $0x38] sm:$0xff]  }
  0x1e   :  { %509 = vmatprep.subr.bf16.mxu0 %v618_v25  ;;  %v54_v35 = vrot.slane %v49_v33, %v53_v32  ;;  %v58_v36 = vrot.slane %v49_v33, %v57_v34  ;;  %523 = vmatprep.mubr.msk.bf16.mxu0 %vm619_vm1, %v618_v25  ;;  %v450_v55 = vld [vmem:[%s742_s4] ss:$0 sm:$0xff] }
  0x1f   :  { %v467_v2 = vld [vmem:[%s744_s6] ss:$0 sm:$0xff] }
  0x20   :  { %481 = vmatpush3.bf16.msra.mxu1 %v547_v13 }
  0x21   :  { %482 = vmatprep.subr.bf16.mxu1 %v548_v14  ;;  %510 = vmatpush3.bf16.msra.mxu0 %v559_v26 }
  0x22   :  { %511 = vmatprep.subr.bf16.mxu0 %v618_v25 }
  0x24   :  { %483 = vmatpush3.bf16.msra.mxu1 %v549_v15 }
  0x25   :  { %484 = vmatprep.subr.bf16.mxu1 %v550_v16  ;;  %512 = vmatpush3.bf16.msra.mxu0 %v560_v27 }
  0x26   :  { %513 = vmatprep.subr.bf16.mxu0 %v618_v25 }
  0x28   :  { %485 = vmatpush3.bf16.msra.mxu1 %v551_v17 }
  0x29   :  { %486 = vmatprep.subr.bf16.mxu1 %v552_v18  ;;  %514 = vmatpush3.bf16.msra.mxu0 %v561_v28 }
  0x2a   :  { %515 = vmatprep.subr.bf16.mxu0 %v618_v25 }
  0x2c   :  { %487 = vmatpush3.bf16.msra.mxu1 %v553_v19 }
  0x2d   :  { %488 = vmatprep.subr.bf16.mxu1 %v554_v20  ;;  %516 = vmatpush3.bf16.msra.mxu0 %v562_v29 }
  0x2e   :  { %517 = vmatprep.subr.bf16.mxu0 %v618_v25 }
  0x30   :  { %489 = vmatpush3.bf16.msra.mxu1 %v555_v21 }
  0x31   :  { %490 = vmatprep.subr.bf16.mxu1 %v556_v22  ;;  %518 = vmatpush3.bf16.msra.mxu0 %v563_v51 }
  0x32   :  { %519 = vmatprep.subr.bf16.mxu0 %v618_v25 }
  0x34   :  { %491 = vmatpush3.bf16.msra.mxu1 %v557_v23 }
  0x35   :  { %520 = vmatpush3.bf16.msra.mxu0 %v564_v52 }
  0x36   :  { %521 = vmatprep.subr.bf16.mxu0 %v618_v25 }
  0x39   :  { %522 = vmatpush3.bf16.msra.mxu0 %v565_v53 }
  0xef   :  { %v119_v37 = vpop.f32.mrb[0].mxu0 }
  0xf0   :  { %v120_v38 = vadd.f32 %v119_v37, %v54_v35  ;;  %v121_v39 = vpop.f32.mrb[1].mxu0 }
  0xf1   :  { %v122_v40 = vadd.f32 %v121_v39, %v58_v36  ;;  %v123_v41 = vpop.f32.mrb[2].mxu0 }
  0xf2   :  { %v124_v42 = vadd.f32 %v123_v41, %v54_v35  ;;  %v125_v43 = vpop.f32.mrb[3].mxu0  ;;  %v128_v45 = vmax.f32 %v120_v38, 0.0 }
  0xf3   :  { %v126_v44 = vadd.f32 %v125_v43, %v58_v36  ;;  %v129_v47 = vmax.f32 %v122_v40, 0.0 }
  0xf4   :  { %v130_v46 = vmax.f32 %v124_v42, 0.0 }
  0xf5   :  { %v131_v48 = vmax.f32 %v126_v44, 0.0 }
  0xf6   :  { %v132_v49 = vpack.c.bf16 %v130_v46, %v128_v45 }
  0xf7   :  { %v133_v50 = vpack.c.bf16 %v131_v48, %v129_v47 }
  0xf9   :  { %301 = vmatprep.mubr.bf16.mxu1 %v133_v50 }
  0xfa   :  { %302 = vmatmul.mubr.bf16.vlgmr.msra.gmra.mrb[0].mxu1 %v132_v49 }
 0x1cd   :  { %v492_v54 = vpop.f32.mrb[0].mxu1 }
 0x1ce   :  { %v493_v56 = vpop.f32.mrb[1].mxu1 }
 0x1cf   :  { %v494_v57 = vadd.f32 %v493_v56, %v492_v54  ;;  %v495_v58 = vpop.f32.mrb[2].mxu1 }
 0x1d0   :  { %v496_v59 = vpop.f32.mrb[3].mxu1 }
 0x1d1   :  { %v304_v60 = vadd.f32 %v494_v57, %v450_v55  ;;  %v497_v61 = vadd.f32 %v496_v59, %v495_v58 }
 0x1d3   :  { %v307_v62 = vadd.f32 %v497_v61, %v450_v55  ;;  %v310_v63 = vmax.f32 %v304_v60, 0.0 }
 0x1d5   :  { %v311_v0 = vmax.f32 %v307_v62, 0.0 }
 0x1d7   :  { %v312_v1 = vpack.c.bf16 %v311_v0, %v310_v63 }
 0x1d9   :  { %524 = vmatmul.mubr.bf16.vlgmr.msra.gmra.mrb[4].mxu0 %v312_v1 }
 0x2ac   :  { %v418_v3 = vpop.f32.mrb[4].mxu0 }
 0x2ad   :  { %v419_v4 = vadd.f32 %v467_v2, %v418_v3  ;;  %v525_v5 = vpop.f32.mrb[5].mxu0 }
 0x2ae   :  { %v421_v6 = vpop.f32.mrb[6].mxu0 }
 0x2af   :  { %426 = vst.msk [vmem:[#allocation5] sm:$0xff] %vm425_vm2, %v419_v4  ;;  %v422_v7 = vadd.f32 %v467_v2, %v421_v6  ;;  %v526_v8 = vpop.f32.mrb[7].mxu0 }
 0x2b1   :  { %427 = vst.msk [vmem:[#allocation5 + $0x8] sm:$0xff] %vm425_vm2, %v422_v7 }
 0x2b2   :  { %432 = vsyncadd [#allocation4], 128  ;;  %s620_s4 = smov [#allocation5]  }
 0x2b3   :  { %s433_s21 = sshll.u32 %s620_s4, 4  ;;  %s434_s21 = int_to_ptr.vmem [resolvable:$true] %s433_s21 }
 0x2b4   :  { %s588_s22 = scalar_lea.vmem %s434_s21, 128  ;;  %s592_s3 = scalar_lea.vmem %s434_s21, 256 }
 0x2b5   :  { %p589_p8 = scmp.ne.s32.totalorder %s434_s21, %s588_s22  ;;  %p593_p9 = scmp.lt.s32.totalorder %s434_s21, %s434_s21 }
 0x2b6   :  { %p594_p10 = scmp.lt.s32.totalorder %s592_s3, %s588_s22 }
 0x2b8   :  { %p595_p11 = por %p594_p10, %p593_p9 }
 0x2ba   :  { %p596_p12 = pnand %p595_p11, %p589_p8 }
 0x2bc   :  { %599 = shalt.err (!%p596_p12)
}
 0x2bd   :  { %s600_s24 = scalar_lea.hbm %s745_s7, 128 }
 0x2be   :  { %p601_p13 = scmp.ne.s32.totalorder %s745_s7, %s600_s24  ;;  %p604_p0 = scmp.lt.u32.totalorder %s600_s24, %s745_s7 }
 0x2c0   :  { %p606_p1 = pnand %p604_p0, %p601_p13 }
 0x2c2   :  { %609 = shalt.err (!%p606_p1)
}
 0x2c3   :  { %s621_s27 = smov 128   ;;  %s622_s28 = smov 8  }
 0x2c4   :  { %439 = dma.vmem_to_hbm [thread:$0]  %s434_s21, 128, %s745_s7, [#allocation4], %s621_s27, %s621_s27, %s622_s28  }
 0x2c5   :  { %612 = dma.done.wait [#allocation4], 256  }
 0x2c6   :  { %613 = vsyncadd [#allocation4], 4294967040 }
 0x2c7   :  { %443 = vsyncpa [#allocation3], 1 }
 0x2c8   :  { %444 = vsyncpa [#allocation4], 1 }

</bundles_post_ra>
